<compile_context>
chip_gen: v5e
topology: v5e:2x2
jax: 0.10.0
libtpu: 0.0.40
codegen_flags: <defaults>
</compile_context>

<pallas_src>
import functools

import jax
import jax.numpy as jnp
from jax.experimental import pallas as pl
from jax.experimental.pallas import tpu as pltpu


# ---------------------------------------------------------------------------
# Kernel A: fused QKV projection (1x1 convs == channel matmuls on the MXU).
# ---------------------------------------------------------------------------
def _qkv_proj_kernel(x_ref, w_ref, b_ref, qkv_ref):
    # x_ref:   (1, C, TN)  f32, channels-major (straight out of NCHW, free reshape)
    # w_ref:   (3C, C)     bf16 fused [Wq*scale; Wk; Wv] (out, in)
    # b_ref:   (3C, 1)     f32 fused [bq*scale; bk; bv]
    # qkv_ref: (1, 3C, TN) bf16 -- spatial positions on lanes (lane-dense store)
    x = x_ref[0].astype(jnp.bfloat16)                        # (C, TN), no transpose
    qkv = jnp.dot(w_ref[...], x,
                  preferred_element_type=jnp.float32)        # (3C, TN), f32 acc
    qkv = qkv + b_ref[...]
    qkv_ref[0] = qkv.astype(qkv_ref.dtype)                   # single lane-dense DMA


# ---------------------------------------------------------------------------
# Kernel B: flash attention (online softmax over kv tiles) + out-proj + RMSNorm.
# Everything kept spatial-on-lanes; no transposes anywhere in the hot path.
# ---------------------------------------------------------------------------
def _flash_attn_kernel(q_ref, k_ref, v_ref, wo_ref, bo_ref, g_ref, o_ref,
                       m_sc, l_sc, acc_sc, *, num_heads, head_dim, eps):
    # q_ref: (1, C, TQ) bf16 ; k_ref/v_ref: (1, C, TK) bf16   (C = H*hd on sublanes)
    # wo_ref: (C, C) bf16 (out, in) ; bo_ref/g_ref: (C, 1) f32 ; o_ref: (1, C, TQ)
    # scratch: m/l (H, 1, TQ) f32 (lane-dense), acc (H, hd, TQ) f32
    ki = pl.program_id(2)

    @pl.when(ki == 0)
    def _init():
        m_sc[...] = jnp.full(m_sc.shape, -jnp.inf, dtype=m_sc.dtype)
        l_sc[...] = jnp.zeros(l_sc.shape, dtype=l_sc.dtype)
        acc_sc[...] = jnp.zeros(acc_sc.shape, dtype=acc_sc.dtype)

    tq = q_ref.shape[2]
    tk = k_ref.shape[2]
    # Head split = leading-dim view split (sublane slicing, free); hd stays on
    # sublanes and spatial stays on lanes.
    q = q_ref[0].reshape(num_heads, head_dim, tq)            # (H, hd, TQ) bf16
    k = k_ref[0].reshape(num_heads, head_dim, tk)            # (H, hd, TK) bf16
    v = v_ref[0].reshape(num_heads, head_dim, tk)            # (H, hd, TK) bf16

    # Scores with kv on sublanes, q on lanes. Scale already folded into Wq/bq.
    s = jnp.einsum("hdk,hdq->hkq", k, q,
                   preferred_element_type=jnp.float32)       # (H, TK, TQ) f32

    m_prev = m_sc[...]                                       # (H, 1, TQ)
    m_new = jnp.maximum(m_prev, jnp.max(s, axis=1, keepdims=True))
    alpha = jnp.exp(m_prev - m_new)                          # (H, 1, TQ)
    # f32 exp (safe on v5e). v6e/v7x option: exp in bf16 for 2x EUP throughput.
    p = jnp.exp(s - m_new)                                   # (H, TK, TQ) f32
    l_sc[...] = alpha * l_sc[...] + jnp.sum(p, axis=1, keepdims=True)
    # PV: full-depth (TK) contraction, output already in (H, hd, TQ) layout.
    acc_sc[...] = alpha * acc_sc[...] + jnp.einsum(
        "hdk,hkq->hdq", v, p.astype(v.dtype),
        preferred_element_type=jnp.float32)
    m_sc[...] = m_new

    @pl.when(ki == pl.num_programs(2) - 1)
    def _finalize():
        cdim = num_heads * head_dim
        # Exact reciprocal: runs once per q tile, negligible cost, better accuracy.
        inv_l = pl.reciprocal(l_sc[...], approx=False)       # (H, 1, TQ)
        attn = (acc_sc[...] * inv_l).reshape(cdim, tq)       # (C, TQ) f32, free view
        # Output 1x1 conv: single full-depth (C,C) @ (C,TQ) contraction -> (C, TQ).
        out = jnp.dot(wo_ref[...], attn.astype(jnp.bfloat16),
                      preferred_element_type=jnp.float32)
        out = out + bo_ref[...]
        # RMSNorm over channels (per spatial position), f32 math.
        ms = jnp.mean(out * out, axis=0, keepdims=True)      # (1, TQ)
        out = out * jax.lax.rsqrt(ms + eps) * g_ref[...]
        # Store is already channels-major with a lane-dense TQ axis: no transpose.
        o_ref[0] = out.astype(o_ref.dtype)


# ---------------------------------------------------------------------------
# Wrapper.
# ---------------------------------------------------------------------------
def _pick_tile(n, candidates):
    for t in candidates:
        if n % t == 0:
            return t
    return n   # single full-extent tile still satisfies the (8,128) block rule


def self_attention_conv(x_nchw, params, *, num_heads, eps=1e-6):
    """x_nchw: (B, C, H, W) float32.  Returns (B, C, H, W) float32."""
    B, C, H, W = x_nchw.shape
    N = H * W
    head_dim = C // num_heads
    assert head_dim * num_heads == C, "embed_dim must be divisible by num_heads"
    assert C % 8 == 0, "embed_dim must be a multiple of 8 for sublane-aligned blocks"
    # TODO(synk): pad/mask spatial positions when H*W is not a multiple of 8.
    assert N % 8 == 0, "H*W must be a multiple of 8 for this kernel"

    # Asymmetric tiles: q tile modest (bounds the (H,TK,TQ) f32 score temp and the
    # v7x 64-MiB VMEM budget), kv tile larger (fewer kv grid steps / less K-V
    # re-DMA per q tile).
    tn = _pick_tile(N, (512, 256, 128))        # QKV-projection spatial tile
    tq = _pick_tile(N, (256, 128))             # attention q tile
    tk = _pick_tile(N, (512, 256, 128))        # attention kv tile

    # NCHW -> (B, C, N) is a free reshape (no HBM transpose); kernels keep this
    # channels-major layout end-to-end (spatial positions always on lanes).
    x_cn = x_nchw.reshape(B, C, N)

    # Conv2d 1x1 weights (Cout, Cin, 1, 1) -> (Cout, Cin) matmul weights.
    def w_mat(w):
        return w[:, :, 0, 0]

    # Fold 1/sqrt(head_dim) into the q projection (one tiny CxC weight scale)
    # instead of scaling the (H, TK, TQ) score tensor every kv step.
    scale = 1.0 / (head_dim ** 0.5)
    wqkv = jnp.concatenate(
        [w_mat(params["wq"]) * scale, w_mat(params["wk"]), w_mat(params["wv"])],
        axis=0).astype(jnp.bfloat16)                                   # (3C, C)
    bqkv = jnp.concatenate(
        [params["bq"] * scale, params["bk"], params["bv"]]
    ).reshape(3 * C, 1).astype(jnp.float32)                            # (3C, 1)
    wo = w_mat(params["wo"]).astype(jnp.bfloat16)                      # (C, C) (out, in)
    bo = params["bo"].reshape(C, 1).astype(jnp.float32)
    g = params["g"].reshape(C, 1).astype(jnp.float32)

    # ---- Kernel A: fused QKV projection, one fused (B, 3C, N) output ---------
    qkv = pl.pallas_call(
        _qkv_proj_kernel,
        out_shape=jax.ShapeDtypeStruct((B, 3 * C, N), jnp.bfloat16),
        grid_spec=pltpu.PrefetchScalarGridSpec(
            num_scalar_prefetch=0,
            grid=(B, N // tn),
            in_specs=[
                pl.BlockSpec((1, C, tn), lambda b, i: (b, 0, i)),      # x (chan-major)
                # Constant-index weight/bias blocks; for very large C consider
                # pipeline_mode=pl.Buffered(1) to single-buffer them.
                pl.BlockSpec((3 * C, C), lambda b, i: (0, 0)),         # fused Wqkv
                pl.BlockSpec((3 * C, 1), lambda b, i: (0, 0)),         # fused bias
            ],
            out_specs=pl.BlockSpec((1, 3 * C, tn), lambda b, i: (b, 0, i)),
        ),
        compiler_params=pltpu.CompilerParams(
            dimension_semantics=("parallel", "parallel")),
    )(x_cn, wqkv, bqkv)

    # ---- Kernel B: flash attention + out-proj + RMSNorm ----------------------
    out_cn = pl.pallas_call(
        functools.partial(_flash_attn_kernel, num_heads=num_heads,
                          head_dim=head_dim, eps=eps),
        out_shape=jax.ShapeDtypeStruct((B, C, N), x_nchw.dtype),
        grid_spec=pltpu.PrefetchScalarGridSpec(
            num_scalar_prefetch=0,
            grid=(B, N // tq, N // tk),              # kv axis last (reduction)
            in_specs=[
                # q / k / v are sublane slabs of the fused qkv array (passed 3x);
                # only the requested (1, C, tile) blocks are DMA'd.
                pl.BlockSpec((1, C, tq), lambda b, qi, ki: (b, 0, qi)),  # Q rows
                pl.BlockSpec((1, C, tk), lambda b, qi, ki: (b, 1, ki)),  # K rows
                pl.BlockSpec((1, C, tk), lambda b, qi, ki: (b, 2, ki)),  # V rows
                pl.BlockSpec((C, C), lambda b, qi, ki: (0, 0)),          # Wo
                pl.BlockSpec((C, 1), lambda b, qi, ki: (0, 0)),          # out bias
                pl.BlockSpec((C, 1), lambda b, qi, ki: (0, 0)),          # RMSNorm gain
            ],
            out_specs=pl.BlockSpec((1, C, tq), lambda b, qi, ki: (b, 0, qi)),
            scratch_shapes=[
                pltpu.VMEM((num_heads, 1, tq), jnp.float32),             # running max
                pltpu.VMEM((num_heads, 1, tq), jnp.float32),             # running sum
                pltpu.VMEM((num_heads, head_dim, tq), jnp.float32),      # acc (H,hd,TQ)
            ],
        ),
        compiler_params=pltpu.CompilerParams(
            dimension_semantics=("parallel", "parallel", "arbitrary")),
    )(qkv, qkv, qkv, wo, bo, g)

    return out_cn.reshape(B, C, H, W)


# ---------------------------------------------------------------------------
# Plain-JAX reference (f32) mirroring the PyTorch forward, for validation.
# ---------------------------------------------------------------------------
def _reference(x_nchw, params, *, num_heads, eps=1e-6):
    B, C, H, W = x_nchw.shape
    N = H * W
    hd = C // num_heads
    x = jnp.transpose(x_nchw.reshape(B, C, N), (0, 2, 1))           # (B, N, C)
    wm = lambda w: jnp.transpose(w[:, :, 0, 0], (1, 0))
    q = x @ wm(params["wq"]) + params["bq"]
    k = x @ wm(params["wk"]) + params["bk"]
    v = x @ wm(params["wv"]) + params["bv"]

    def split(t):  # (B, N, C) -> (B, heads, N, hd)
        return jnp.transpose(t.reshape(B, N, num_heads, hd), (0, 2, 1, 3))

    qh, kh, vh = split(q), split(k), split(v)
    s = jnp.einsum("bhnd,bhmd->bhnm", qh, kh) / (hd ** 0.5)
    p = jax.nn.softmax(s, axis=-1)
    a = jnp.einsum("bhnm,bhmd->bhnd", p, vh)                        # (B, h, N, hd)
    a = jnp.transpose(a, (0, 2, 1, 3)).reshape(B, N, C)
    o = a @ wm(params["wo"]) + params["bo"]
    o = o * jax.lax.rsqrt(jnp.mean(o * o, axis=-1, keepdims=True) + eps)
    o = o * params["g"]
    return jnp.transpose(o, (0, 2, 1)).reshape(B, C, H, W)


def init_params(key, embed_dim):
    """Deterministic init mimicking PyTorch Conv2d default (uniform +-1/sqrt(fan_in))."""
    C = embed_dim
    bound = 1.0 / (C ** 0.5)
    keys = jax.random.split(key, 8)
    u = lambda k, shape: jax.random.uniform(k, shape, jnp.float32, -bound, bound)
    return {
        "wq": u(keys[0], (C, C, 1, 1)), "bq": u(keys[1], (C,)),
        "wk": u(keys[2], (C, C, 1, 1)), "bk": u(keys[3], (C,)),
        "wv": u(keys[4], (C, C, 1, 1)), "bv": u(keys[5], (C,)),
        "wo": u(keys[6], (C, C, 1, 1)), "bo": u(keys[7], (C,)),
        "g": jnp.ones((C,), jnp.float32),
    }


if __name__ == "__main__":
    B, C, H, W = 2, 64, 16, 16        # N = 256
    num_heads = 4

    key = jax.random.PRNGKey(0)
    kx, kp = jax.random.split(key)
    x = jax.random.normal(kx, (B, C, H, W), jnp.float32)
    params = init_params(kp, C)

    out = self_attention_conv(x, params, num_heads=num_heads)
    out = jax.block_until_ready(out)

    ref = _reference(x, params, num_heads=num_heads)
    assert out.shape == (B, C, H, W)
    max_err = float(jnp.max(jnp.abs(out - ref)))
    # bf16 MXU operands (with f32 accumulation) -> loosened tolerance vs f32 reference.
    assert jnp.allclose(out, ref, atol=3e-2, rtol=3e-2), (
        f"mismatch vs JAX reference (max abs err = {max_err})")
    print("KERNEL_OK")
</pallas_src>

<mosaic_0001>
module attributes {stable_mosaic.version = 11 : i64} {
  func.func @_qkv_proj_kernel(%arg0: i32, %arg1: i32, %arg2: memref<1x64x256xf32, #tpu.memory_space<vmem>>, %arg3: memref<192x64xbf16, #tpu.memory_space<vmem>>, %arg4: memref<192x1xf32, #tpu.memory_space<vmem>>, %arg5: memref<1x192x256xbf16, #tpu.memory_space<vmem>>) attributes {dimension_semantics = [#tpu.dimension_semantics<parallel>, #tpu.dimension_semantics<parallel>], iteration_bounds = array<i64: 2, 1>, scalar_prefetch = 0 : i64, scratch_operands = 0 : i64, tpu.core_type = #tpu.core_type<tc>, window_params = [{transform_indices = @transform_0, window_bounds = array<i64: 1, 64, 256>}, {pipeline_mode = #tpu.pipeline_mode<synchronous>, transform_indices = @transform_1, window_bounds = array<i64: 192, 64>}, {pipeline_mode = #tpu.pipeline_mode<synchronous>, transform_indices = @transform_2, window_bounds = array<i64: 192, 1>}, {transform_indices = @transform_3, window_bounds = array<i64: 1, 192, 256>}]} {
    %c0 = arith.constant 0 : index
    %c0_0 = arith.constant 0 : index
    %c0_1 = arith.constant 0 : index
    %0 = vector.load %arg2[%c0, %c0_0, %c0_1] : memref<1x64x256xf32, #tpu.memory_space<vmem>>, vector<1x64x256xf32>
    %1 = vector.shape_cast %0 : vector<1x64x256xf32> to vector<64x256xf32>
    %2 = arith.truncf %1 : vector<64x256xf32> to vector<64x256xbf16>
    %c0_2 = arith.constant 0 : index
    %c0_3 = arith.constant 0 : index
    %3 = vector.load %arg3[%c0_2, %c0_3] : memref<192x64xbf16, #tpu.memory_space<vmem>>, vector<192x64xbf16>
    %cst = arith.constant dense<0.000000e+00> : vector<192x256xf32>
    %4 = tpu.matmul %3, %2, %cst {dimension_numbers = #tpu.dot_dimension_numbers<[1], [0], [0], [1], [0, 0, 1, 1], [], []>} : vector<192x64xbf16>, vector<64x256xbf16>, vector<192x256xf32> -> vector<192x256xf32>
    %c0_4 = arith.constant 0 : index
    %c0_5 = arith.constant 0 : index
    %5 = vector.load %arg4[%c0_4, %c0_5] : memref<192x1xf32, #tpu.memory_space<vmem>>, vector<192x1xf32>
    %6 = vector.broadcast %5 : vector<192x1xf32> to vector<192x256xf32>
    %7 = arith.addf %4, %6 : vector<192x256xf32>
    %8 = arith.truncf %7 : vector<192x256xf32> to vector<192x256xbf16>
    %c0_6 = arith.constant 0 : index
    %c0_7 = arith.constant 0 : index
    %c0_8 = arith.constant 0 : index
    %9 = vector.load %arg5[%c0_6, %c0_7, %c0_8] : memref<1x192x256xbf16, #tpu.memory_space<vmem>>, vector<1x192x256xbf16>
    %10 = vector.shape_cast %9 : vector<1x192x256xbf16> to vector<192x256xbf16>
    %11 = vector.shape_cast %8 : vector<192x256xbf16> to vector<1x192x256xbf16>
    tpu.vector_store %arg5[%c0_6, %c0_7, %c0_8], %11 {strides = array<i32>} : memref<1x192x256xbf16, #tpu.memory_space<vmem>>, vector<1x192x256xbf16>,
    return
  }
  func.func @transform_0(%arg0: i32, %arg1: i32) -> (i32, i32, i32) {
    %c0_i32 = arith.constant 0 : i32
    %c0_i32_0 = arith.constant 0 : i32
    return %arg0, %c0_i32, %arg1 : i32, i32, i32
  }
  func.func @transform_1(%arg0: i32, %arg1: i32) -> (i32, i32) {
    %c0_i32 = arith.constant 0 : i32
    %c0_i32_0 = arith.constant 0 : i32
    %c0_i32_1 = arith.constant 0 : i32
    return %c0_i32, %c0_i32_0 : i32, i32
  }
  func.func @transform_2(%arg0: i32, %arg1: i32) -> (i32, i32) {
    %c0_i32 = arith.constant 0 : i32
    %c0_i32_0 = arith.constant 0 : i32
    %c0_i32_1 = arith.constant 0 : i32
    return %c0_i32, %c0_i32_0 : i32, i32
  }
  func.func @transform_3(%arg0: i32, %arg1: i32) -> (i32, i32, i32) {
    %c0_i32 = arith.constant 0 : i32
    %c0_i32_0 = arith.constant 0 : i32
    return %arg0, %c0_i32, %arg1 : i32, i32, i32
  }
}

</mosaic_0001>

<bundles_post_ra>
// kernel: tpu_custom_call.1
= control target key start
LH: loop header
LB: loop body
LE: loop exit
PB: predicated region body
PF: predicated region fallthrough
CT: control target
= control target key end

     0   :  { %8 = vsyncpa [#allocation3], 0  ;;  %s1352_s0 = inlined_call_operand.vmem [shape: f32[2,64,256], index: 0, kind: input, shape index: {}]   ;;  %s1353_s1 = inlined_call_operand.vmem [shape: bf16[192,64], index: 1, kind: input, shape index: {}]   ;;  %s1354_s2 = inlined_call_operand.vmem [shape: f32[192,1], index: 2, kind: input, shape index: {}]   ;;  %s1355_s3 = inlined_call_operand.hbm [shape: bf16[2,192,256], index: 3, kind: output, shape index: {}]  }
   0x1   :  { %10 = vsyncpa [#allocation3 + $0x1], 0  ;;  %s1042_s12 = smov 0   ;;  %s1044_s13 = smov 0  }
   0x2   :  { %s1046_s14 = smov 0   ;;  %s1048_s15 = smov 0  }
   0x3   :  { %s1050_s16 = smov 0   ;;  %s1052_s17 = smov 0  }
   0x4 LB: > { %s773_s18 = sadd.s32 4294967295, %s1017_s17   ;;  %s774_s19 = sadd.s32 4294967294, %s1017_s17   ;;  %s1017_s17 = sphi %s1052_s17, %s16_s17   ;;  %s1013_s16 = sphi %s1050_s16, %s1362_s16   ;;  %s1009_s15 = sphi %s1048_s15, %s1361_s15   ;;  %s1005_s14 = sphi %s1046_s14, %s1360_s14   ;;  %s1001_s13 = sphi %s1044_s13, %s1359_s13   ;;  %s997_s12 = sphi %s1042_s12, %s1358_s12  }
   0x5   : > { %s28_s20 = sadd.s32 1, %s1013_s16  ;;  %s107_s21 = sadd.s32 1, %s1005_s14 }
   0x6   : > { %p30_p0 = scmp.ge.s32.totalorder %s28_s20, 2  ;;  %p117_p1 = scmp.ne.s32.totalorder %s1005_s14, %s1001_s13 }
   0x7   : > { %p118_p2 = scmp.eq.s32.totalorder %s773_s18, 1  ;;  %p123_p3 = scmp.ne.s32.totalorder %s1001_s13, %s997_s12 }
   0x8   : > { %s1364_s20 = smov (%p30_p0, %s28_s20), 0  ;;  %p124_p5 = scmp.eq.s32.totalorder %s774_s19, 1 }
   0x9   : > { %p1082_p4 = por %p118_p2, %p117_p1  ;;  %s102_s23 = ssub.s32 %s1013_s16, %s1364_s20 }
   0xa   : > { %p777_p6 = scmp.ge.s32.totalorder %s1017_s17, 1  ;;  %p105_p7 = scmp.eq.s32.totalorder %s102_s23, 0 }
   0xb   : > { %p1089_p8 = por %p124_p5, %p123_p3  ;;  %p161_p9 = scmp.lt.s32.totalorder %s1017_s17, 3 }
   0xc   : > { %s1095_s25 = scalar_select %p105_p7, %s1005_s14, %s107_s21  }
   0xd   : > { %p162_p10 = pnand %p777_p6, %p161_p9 }
   0xe   : > { %p190_p11 = scmp.lt.s32.totalorder (!%p162_p10), %s1009_s15, 1  ;;  %s186_s8 = sand.u32 (!%p162_p10), 1, %s1001_s13  }
   0xf   : > { %165 = sbr.rel (%p162_p10) target bundleno = 271 (0x10f), region = 32  ;;  %s677_s26 = scalar_lea.sflag (!%p162_p10), [#allocation3], %s186_s8 }
  0x10   : > { %s876_s9 = smul.u32 (!%p162_p10), 192, %s186_s8 }
  0x11   : > { %s877_s11 = smul.u32 (!%p162_p10), 192, %s1009_s15 }
  0x12   : > { %s1269_s10 = scalar_lea.vmem (!%p162_p10), [#allocation2], %s876_s9 }
  0x13   : > { %s690_s21 = scalar_lea.hbm (!%p162_p10), %s1355_s3, %s877_s11 }
  0x14   : > { %v249_v0 = vld [vmem:[%s1354_s2] sm:$0xff]  ;;  %v251_v1 = vld [vmem:[%s1354_s2 + $0x10] sm:$0xff]  ;;  %v1019_v2 = vmov 0   ;;  %s191_s30 = scalar_select %p190_p11, %s1009_s15, 1  ;;  %v250_v6 = vld [vmem:[%s1354_s2 + $0x8] sm:$0xff]  ;;  %vm453_vm0 = vcmask 523264  }
  0x15   : > { %936 = vset.pattern.permute.xlu0 %v1019_v2  ;;  %937 = vset.pattern.permute.xlu1 %v1019_v2  ;;  %v252_v14 = vld [vmem:[%s1354_s2 + $0x18] sm:$0xff]  ;;  %v253_v21 = vld [vmem:[%s1354_s2 + $0x20] sm:$0xff]  ;;  %v255_v28 = vld [vmem:[%s1354_s2 + $0x30] sm:$0xff]  ;;  %s691_s15 = sshll.u32 %s1269_s10, 4  ;;  %s693_s23 = sshll.u32 %s690_s21, 4  ;;  %s692_s15 = int_to_ptr.vmem [resolvable:$true] %s691_s15  ;;  %s694_s23 = int_to_ptr.hbm [resolvable:$true] %s693_s23 }
  0x16   : > { %275 = vperm.xlu0 %936, %v249_v0   ;;  %285 = vperm.xlu1 %937, %v251_v1   ;;  %s855_s4 = sshll.u32 %s191_s30, 7  ;;  %v256_v29 = vld [vmem:[%s1354_s2 + $0x38] sm:$0xff]  ;;  %v254_v31 = vld [vmem:[%s1354_s2 + $0x28] sm:$0xff]  ;;  %v856_v33 = vld [vmem:[%s1353_s1] sm:$0xff]  ;;  %s953_s27 = sshra.s32 %s694_s23, 4  ;;  %s954_s27 = int_to_ptr.hbm [resolvable:$true] %s953_s27 }
  0x17   : > { %938 = vset.pattern.permute.xlu2 %v1019_v2  ;;  %s1108_s7 = scalar_lea.vmem %s1352_s0, %s855_s4  ;;  %v862_v34 = vld [vmem:[%s1353_s1 + $0x30] sm:$0xff]  ;;  %v258_v35 = vld [vmem:[%s1354_s2 + $0x48] sm:$0xff]  ;;  %v257_v37 = vld [vmem:[%s1354_s2 + $0x40] sm:$0xff]  ;;  %s955_s28 = scalar_lea.hbm %s954_s27, 192 }
  0x18   : > { %v213_v3 = vld [vmem:[%s1108_s7 + $0x60] sm:$0xff]  ;;  %v215_v4 = vld [vmem:[%s1108_s7 + $0x70] sm:$0xff]  ;;  %v214_v5 = vld [vmem:[%s1108_s7 + $0x68] sm:$0xff]  ;;  %295 = vperm.xlu2 %938, %v253_v21   ;;  %p956_p12 = scmp.ne.s32.totalorder %s954_s27, %s955_s28  ;;  %s959_s4 = scalar_lea.hbm %s1355_s3, 384 }
  0x19   : > { %v223_v7 = vpack.c.bf16 %v215_v4, %v213_v3  ;;  %v216_v8 = vld [vmem:[%s1108_s7 + $0x78] sm:$0xff]  ;;  %v209_v9 = vld [vmem:[%s1108_s7 + $0x40] sm:$0xff]  ;;  %v211_v10 = vld [vmem:[%s1108_s7 + $0x50] sm:$0xff]  ;;  %p960_p1 = scmp.lt.s32.totalorder %s954_s27, %s1355_s3  ;;  %p961_p2 = scmp.lt.s32.totalorder %s959_s4, %s955_s28 }
  0x1a   : > { %v224_v11 = vpack.c.bf16 %v216_v8, %v214_v5  ;;  %v210_v12 = vld [vmem:[%s1108_s7 + $0x48] sm:$0xff]  ;;  %v212_v13 = vld [vmem:[%s1108_s7 + $0x58] sm:$0xff]  ;;  %v221_v15 = vpack.c.bf16 %v211_v10, %v209_v9  ;;  %v205_v17 = vld [vmem:[%s1108_s7 + $0x20] sm:$0xff]  ;;  %p957_p13 = pnand %p956_p12, %p1082_p4 }
  0x1b   : > { %494 = vmatpush.bf16.msra.mxu0 %v223_v7  ;;  %868 = vmatpush.bf16.msra.mxu2 %v223_v7  ;;  %v222_v16 = vpack.c.bf16 %v212_v13, %v210_v12  ;;  %v207_v18 = vld [vmem:[%s1108_s7 + $0x30] sm:$0xff]  ;;  %v206_v19 = vld [vmem:[%s1108_s7 + $0x28] sm:$0xff]  ;;  %v208_v20 = vld [vmem:[%s1108_s7 + $0x38] sm:$0xff]  ;;  %p962_p3 = por %p961_p2, %p960_p1 }
  0x1c   : > { %563 = vmatpush.bf16.msra.mxu1 %v224_v11  ;;  %872 = vmatpush.bf16.msra.mxu3 %v224_v11  ;;  %v219_v22 = vpack.c.bf16 %v207_v18, %v205_v17  ;;  %v220_v23 = vpack.c.bf16 %v208_v20, %v206_v19  ;;  %v201_v24 = vld [vmem:[%s1108_s7] sm:$0xff]  ;;  %v203_v25 = vld [vmem:[%s1108_s7 + $0x10] sm:$0xff]  ;;  %v202_v26 = vld [vmem:[%s1108_s7 + $0x8] sm:$0xff]  ;;  %p958_p0 = pneg %p957_p13 }
  0x1d   : > { %v204_v27 = vld [vmem:[%s1108_s7 + $0x18] sm:$0xff]  ;;  %v217_v30 = vpack.c.bf16 %v203_v25, %v201_v24  ;;  %v259_v36 = vld [vmem:[%s1354_s2 + $0x50] sm:$0xff]  ;;  %v261_v38 = vld [vmem:[%s1354_s2 + $0x60] sm:$0xff] }
  0x1e   : > { %280 = vperm.xlu0 %936, %v250_v6   ;;  %290 = vperm.xlu1 %937, %v252_v14   ;;  %v218_v32 = vpack.c.bf16 %v204_v27, %v202_v26  ;;  %v262_v39 = vld [vmem:[%s1354_s2 + $0x68] sm:$0xff]  ;;  %v260_v40 = vld [vmem:[%s1354_s2 + $0x58] sm:$0xff]  ;;  %v265_v43 = vld [vmem:[%s1354_s2 + $0x80] sm:$0xff]  ;;  %p963_p5 = pnand %p962_p3, %p958_p0 }
  0x1f   : > { %495 = vmatpush.bf16.msra.mxu0 %v221_v15  ;;  %869 = vmatpush.bf16.msra.mxu2 %v221_v15  ;;  %v857_v41 = vld [vmem:[%s1353_s1 + $0x8] sm:$0xff]  ;;  %v863_v42 = vld [vmem:[%s1353_s1 + $0x38] sm:$0xff]  ;;  %v263_v45 = vld [vmem:[%s1354_s2 + $0x70] sm:$0xff] }
  0x20   : > { %564 = vmatpush.bf16.msra.mxu1 %v222_v16  ;;  %873 = vmatpush.bf16.msra.mxu3 %v222_v16  ;;  %v264_v44 = vld [vmem:[%s1354_s2 + $0x78] sm:$0xff]  ;;  %v267_v47 = vld [vmem:[%s1354_s2 + $0x90] sm:$0xff]  ;;  %v266_v48 = vld [vmem:[%s1354_s2 + $0x88] sm:$0xff] }
  0x21   : > { %300 = vperm.xlu2 %938, %v254_v31   ;;  %v268_v46 = vld [vmem:[%s1354_s2 + $0x98] sm:$0xff]  ;;  %v858_v49 = vld [vmem:[%s1353_s1 + $0x10] sm:$0xff]  ;;  %v864_v50 = vld [vmem:[%s1353_s1 + $0x40] sm:$0xff] }
  0x22   : > { %v271_v51 = vld [vmem:[%s1354_s2 + $0xb0] sm:$0xff]  ;;  %v270_v52 = vld [vmem:[%s1354_s2 + $0xa8] sm:$0xff]  ;;  %v269_v53 = vld [vmem:[%s1354_s2 + $0xa0] sm:$0xff] }
  0x23   : > { %496 = vmatpush.bf16.msra.mxu0 %v219_v22  ;;  %870 = vmatpush.bf16.msra.mxu2 %v219_v22  ;;  %v272_v54 = vld [vmem:[%s1354_s2 + $0xb8] sm:$0xff]  ;;  %v865_v56 = vld [vmem:[%s1353_s1 + $0x48] sm:$0xff]  ;;  %v860_v57 = vld [vmem:[%s1353_s1 + $0x20] sm:$0xff] }
  0x24   : > { %565 = vmatpush.bf16.msra.mxu1 %v220_v23  ;;  %874 = vmatpush.bf16.msra.mxu3 %v220_v23  ;;  %v859_v55 = vld [vmem:[%s1353_s1 + $0x18] sm:$0xff]  ;;  %v866_v58 = vld [vmem:[%s1353_s1 + $0x50] sm:$0xff]  ;;  %v861_v59 = vld [vmem:[%s1353_s1 + $0x28] sm:$0xff] }
  0x25   : > { %v867_v60 = vld [vmem:[%s1353_s1 + $0x58] sm:$0xff] }
  0x26   : > { %305 = vperm.xlu0 %936, %v255_v28   ;;  %310 = vperm.xlu1 %937, %v256_v29  }
  0x27   : > { %497 = vmatpush.bf16.msra.mxu0 %v217_v30  ;;  %871 = vmatpush.bf16.msra.mxu2 %v217_v30 }
  0x28   : > { %566 = vmatpush.bf16.msra.mxu1 %v218_v32  ;;  %875 = vmatpush.bf16.msra.mxu3 %v218_v32 }
  0x29   : > { %315 = vperm.xlu2 %938, %v257_v37  }
  0x2a   : > { %828 = vmatmul.msk.bf16.vlgmr.msra.gmra.mxu0 %vm453_vm0, %v856_v33  ;;  %834 = vmatmul.msk.bf16.vlgmr.msra.gmra.mxu2 %vm453_vm0, %v862_v34 }
  0x2b   : > { %840 = vmatmul.msk.bf16.vlgmr.msra.gmra.mxu1 %vm453_vm0, %v856_v33  ;;  %846 = vmatmul.msk.bf16.vlgmr.msra.gmra.mxu3 %vm453_vm0, %v862_v34 }
  0x2e   : > { %320 = vperm.xlu0 %936, %v258_v35   ;;  %325 = vperm.xlu1 %937, %v259_v36  }
  0x31   : > { %330 = vperm.xlu2 %938, %v260_v40  }
  0x36   : > { %335 = vperm.xlu0 %936, %v261_v38   ;;  %340 = vperm.xlu1 %937, %v262_v39  }
  0x39   : > { %345 = vperm.xlu2 %938, %v263_v45  }
  0x3a   : > { %829 = vmatmul.msk.bf16.gmra.mxu0 %vm453_vm0, %v857_v41  ;;  %835 = vmatmul.msk.bf16.gmra.mxu2 %vm453_vm0, %v863_v42 }
  0x3b   : > { %841 = vmatmul.msk.bf16.gmra.mxu1 %vm453_vm0, %v857_v41  ;;  %847 = vmatmul.msk.bf16.gmra.mxu3 %vm453_vm0, %v863_v42 }
  0x3e   : > { %355 = vperm.xlu1 %937, %v265_v43   ;;  %350 = vperm.xlu0 %936, %v264_v44  }
  0x41   : > { %360 = vperm.xlu2 %938, %v266_v48  }
  0x46   : > { %370 = vperm.xlu1 %937, %v268_v46   ;;  %365 = vperm.xlu0 %936, %v267_v47  }
  0x49   : > { %375 = vperm.xlu2 %938, %v269_v53  }
  0x4a   : > { %830 = vmatmul.msk.bf16.gmra.mxu0 %vm453_vm0, %v858_v49  ;;  %836 = vmatmul.msk.bf16.gmra.mxu2 %vm453_vm0, %v864_v50 }
  0x4b   : > { %842 = vmatmul.msk.bf16.gmra.mxu1 %vm453_vm0, %v858_v49  ;;  %848 = vmatmul.msk.bf16.gmra.mxu3 %vm453_vm0, %v864_v50 }
  0x4e   : > { %385 = vperm.xlu1 %937, %v271_v51   ;;  %380 = vperm.xlu0 %936, %v270_v52  }
  0x51   : > { %390 = vperm.xlu2 %938, %v272_v54  }
  0x5a   : > { %831 = vmatmul.msk.bf16.gmra.mxu0 %vm453_vm0, %v859_v55  ;;  %837 = vmatmul.msk.bf16.gmra.mxu2 %vm453_vm0, %v865_v56 }
  0x5b   : > { %843 = vmatmul.msk.bf16.gmra.mxu1 %vm453_vm0, %v859_v55  ;;  %849 = vmatmul.msk.bf16.gmra.mxu3 %vm453_vm0, %v865_v56 }
  0x6a   : > { %832 = vmatmul.msk.bf16.gmra.mxu0 %vm453_vm0, %v860_v57  ;;  %838 = vmatmul.msk.bf16.gmra.mxu2 %vm453_vm0, %v866_v58 }
  0x6b   : > { %844 = vmatmul.msk.bf16.gmra.mxu1 %vm453_vm0, %v860_v57  ;;  %850 = vmatmul.msk.bf16.gmra.mxu3 %vm453_vm0, %v866_v58 }
  0x72   : > { %v1252_v0 = vpop.permute.xlu2 %295 }
  0x7a   : > { %833 = vmatmul.msk.bf16.gmra.mxu0 %vm453_vm0, %v861_v59  ;;  %839 = vmatmul.msk.bf16.gmra.mxu2 %vm453_vm0, %v867_v60 }
  0x7b   : > { %845 = vmatmul.msk.bf16.gmra.mxu1 %vm453_vm0, %v861_v59  ;;  %851 = vmatmul.msk.bf16.gmra.mxu3 %vm453_vm0, %v867_v60  ;;  %v1256_v3 = vpop.permute.xlu2 %300 }
  0x83   : > { %v1265_v9 = vpop.permute.xlu2 %315 }
  0x88   : > { %v276_v61 = vpop.permute.xlu0 %275  ;;  %v286_v62 = vpop.permute.xlu1 %285 }
  0x8b   : > { %v1272_v23 = vpop.permute.xlu2 %330 }
  0x90   : > { %v281_v63 = vpop.permute.xlu0 %280  ;;  %v291_v1 = vpop.permute.xlu1 %290 }
  0x93   : > { %v346_v36 = vpop.permute.xlu2 %345 }
  0x98   : > { %v1254_v2 = vpop.permute.xlu0 %305  ;;  %v1258_v4 = vpop.permute.xlu1 %310 }
  0xa0   : > { %v1260_v5 = vpop.permute.xlu0 %320  ;;  %v1267_v11 = vpop.permute.xlu1 %325 }
  0xa7   : > { %v499_v6 = vpop.f32.mrf.mxu0 }
  0xa8   : > { %v500_v7 = vadd.f32 %v499_v6, %v276_v61  ;;  %v568_v8 = vpop.f32.mrf.mxu1  ;;  %v336_v13 = vpop.permute.xlu0 %335 }
  0xa9   : > { %v569_v10 = vadd.f32 %v568_v8, %v276_v61  ;;  %v341_v25 = vpop.permute.xlu1 %340 }
  0xab   : > { %v628_v12 = vpack.c.bf16 %v569_v10, %v500_v7  ;;  %v361_v10 = vpop.permute.xlu2 %360 }
  0xad   : > { %652 = vst [vmem:[%s1269_s10] sm:$0xff] %v628_v12  ;;  %v529_v14 = vpop.f32.mrf.mxu2 }
  0xae   : > { %v530_v15 = vadd.f32 %v529_v14, %v336_v13  ;;  %v598_v16 = vpop.f32.mrf.mxu3 }
  0xaf   : > { %v599_v17 = vadd.f32 %v598_v16, %v336_v13  ;;  %v501_v18 = vpop.f32.mrf.mxu0 }
  0xb0   : > { %v502_v19 = vadd.f32 %v501_v18, %v281_v63  ;;  %v570_v20 = vpop.f32.mrf.mxu1  ;;  %v351_v47 = vpop.permute.xlu0 %350 }
  0xb1   : > { %v640_v21 = vpack.c.bf16 %v599_v17, %v530_v15  ;;  %v571_v22 = vadd.f32 %v570_v20, %v281_v63  ;;  %v356_v58 = vpop.permute.xlu1 %355 }
  0xb3   : > { %664 = vst [vmem:[%s1269_s10 + $0x60] sm:$0xff] %v640_v21  ;;  %v629_v24 = vpack.c.bf16 %v571_v22, %v502_v19 }
  0xb5   : > { %653 = vst [vmem:[%s1269_s10 + $0x8] sm:$0xff] %v629_v24  ;;  %v531_v26 = vpop.f32.mrf.mxu2 }
  0xb6   : > { %v532_v27 = vadd.f32 %v531_v26, %v341_v25  ;;  %v600_v28 = vpop.f32.mrf.mxu3 }
  0xb7   : > { %v601_v29 = vadd.f32 %v600_v28, %v341_v25  ;;  %v504_v30 = vpop.f32.mrf.mxu0 }
  0xb8   : > { %v505_v31 = vadd.f32 %v504_v30, %v286_v62  ;;  %v573_v32 = vpop.f32.mrf.mxu1  ;;  %v366_v21 = vpop.permute.xlu0 %365 }
  0xb9   : > { %v641_v33 = vpack.c.bf16 %v601_v29, %v532_v27  ;;  %v574_v34 = vadd.f32 %v573_v32, %v286_v62  ;;  %v371_v32 = vpop.permute.xlu1 %370 }
  0xbb   : > { %665 = vst [vmem:[%s1269_s10 + $0x68] sm:$0xff] %v641_v33  ;;  %v630_v35 = vpack.c.bf16 %v574_v34, %v505_v31 }
  0xbd   : > { %654 = vst [vmem:[%s1269_s10 + $0x10] sm:$0xff] %v630_v35  ;;  %v534_v37 = vpop.f32.mrf.mxu2 }
  0xbe   : > { %v535_v38 = vadd.f32 %v534_v37, %v346_v36  ;;  %v603_v39 = vpop.f32.mrf.mxu3 }
  0xbf   : > { %v604_v40 = vadd.f32 %v603_v39, %v346_v36  ;;  %v506_v41 = vpop.f32.mrf.mxu0 }
  0xc0   : > { %v507_v42 = vadd.f32 %v506_v41, %v291_v1  ;;  %v575_v43 = vpop.f32.mrf.mxu1 }
  0xc1   : > { %v642_v44 = vpack.c.bf16 %v604_v40, %v535_v38  ;;  %v576_v45 = vadd.f32 %v575_v43, %v291_v1 }
  0xc3   : > { %666 = vst [vmem:[%s1269_s10 + $0x70] sm:$0xff] %v642_v44  ;;  %v631_v46 = vpack.c.bf16 %v576_v45, %v507_v42  ;;  %v376_v42 = vpop.permute.xlu2 %375 }
  0xc5   : > { %655 = vst [vmem:[%s1269_s10 + $0x18] sm:$0xff] %v631_v46  ;;  %v536_v48 = vpop.f32.mrf.mxu2 }
  0xc6   : > { %v537_v49 = vadd.f32 %v536_v48, %v351_v47  ;;  %v605_v50 = vpop.f32.mrf.mxu3 }
  0xc7   : > { %v606_v51 = vadd.f32 %v605_v50, %v351_v47  ;;  %v509_v52 = vpop.f32.mrf.mxu0 }
  0xc8   : > { %v510_v53 = vadd.f32 %v509_v52, %v1252_v0  ;;  %v578_v54 = vpop.f32.mrf.mxu1  ;;  %v381_v52 = vpop.permute.xlu0 %380 }
  0xc9   : > { %v643_v55 = vpack.c.bf16 %v606_v51, %v537_v49  ;;  %v579_v56 = vadd.f32 %v578_v54, %v1252_v0 }
  0xcb   : > { %667 = vst [vmem:[%s1269_s10 + $0x78] sm:$0xff] %v643_v55  ;;  %v632_v57 = vpack.c.bf16 %v579_v56, %v510_v53 }
  0xcd   : > { %656 = vst [vmem:[%s1269_s10 + $0x20] sm:$0xff] %v632_v57  ;;  %v539_v59 = vpop.f32.mrf.mxu2 }
  0xce   : > { %v540_v60 = vadd.f32 %v539_v59, %v356_v58  ;;  %v608_v61 = vpop.f32.mrf.mxu3 }
  0xcf   : > { %v609_v62 = vadd.f32 %v608_v61, %v356_v58  ;;  %v511_v63 = vpop.f32.mrf.mxu0 }
  0xd0   : > { %v512_v1 = vadd.f32 %v511_v63, %v1256_v3  ;;  %v580_v6 = vpop.f32.mrf.mxu1 }
  0xd1   : > { %v644_v7 = vpack.c.bf16 %v609_v62, %v540_v60  ;;  %v581_v8 = vadd.f32 %v580_v6, %v1256_v3  ;;  %v386_v62 = vpop.permute.xlu1 %385 }
  0xd3   : > { %668 = vst [vmem:[%s1269_s10 + $0x80] sm:$0xff] %v644_v7  ;;  %v633_v0 = vpack.c.bf16 %v581_v8, %v512_v1 }
  0xd5   : > { %657 = vst [vmem:[%s1269_s10 + $0x28] sm:$0xff] %v633_v0  ;;  %v541_v12 = vpop.f32.mrf.mxu2 }
  0xd6   : > { %v542_v13 = vadd.f32 %v541_v12, %v361_v10  ;;  %v610_v14 = vpop.f32.mrf.mxu3 }
  0xd7   : > { %v611_v15 = vadd.f32 %v610_v14, %v361_v10  ;;  %v514_v16 = vpop.f32.mrf.mxu0  ;;  %v391_v14 = vpop.permute.xlu2 %390 }
  0xd8   : > { %v515_v17 = vadd.f32 %v514_v16, %v1254_v2  ;;  %v583_v18 = vpop.f32.mrf.mxu1 }
  0xd9   : > { %v645_v19 = vpack.c.bf16 %v611_v15, %v542_v13  ;;  %v584_v20 = vadd.f32 %v583_v18, %v1254_v2 }
  0xdb   : > { %669 = vst [vmem:[%s1269_s10 + $0x88] sm:$0xff] %v645_v19  ;;  %v634_v3 = vpack.c.bf16 %v584_v20, %v515_v17 }
  0xdd   : > { %658 = vst [vmem:[%s1269_s10 + $0x30] sm:$0xff] %v634_v3  ;;  %v544_v22 = vpop.f32.mrf.mxu2 }
  0xde   : > { %v545_v24 = vadd.f32 %v544_v22, %v366_v21  ;;  %v613_v25 = vpop.f32.mrf.mxu3 }
  0xdf   : > { %v614_v26 = vadd.f32 %v613_v25, %v366_v21  ;;  %v516_v27 = vpop.f32.mrf.mxu0 }
  0xe0   : > { %v517_v28 = vadd.f32 %v516_v27, %v1258_v4  ;;  %v585_v29 = vpop.f32.mrf.mxu1 }
  0xe1   : > { %v646_v30 = vpack.c.bf16 %v614_v26, %v545_v24  ;;  %v586_v31 = vadd.f32 %v585_v29, %v1258_v4 }
  0xe3   : > { %670 = vst [vmem:[%s1269_s10 + $0x90] sm:$0xff] %v646_v30  ;;  %v635_v2 = vpack.c.bf16 %v586_v31, %v517_v28 }
  0xe5   : > { %659 = vst [vmem:[%s1269_s10 + $0x38] sm:$0xff] %v635_v2  ;;  %v546_v33 = vpop.f32.mrf.mxu2 }
  0xe6   : > { %v547_v34 = vadd.f32 %v546_v33, %v371_v32  ;;  %v615_v35 = vpop.f32.mrf.mxu3 }
  0xe7   : > { %v616_v36 = vadd.f32 %v615_v35, %v371_v32  ;;  %v519_v37 = vpop.f32.mrf.mxu0 }
  0xe8   : > { %v520_v38 = vadd.f32 %v519_v37, %v1265_v9  ;;  %v588_v39 = vpop.f32.mrf.mxu1 }
  0xe9   : > { %v647_v40 = vpack.c.bf16 %v616_v36, %v547_v34  ;;  %v589_v41 = vadd.f32 %v588_v39, %v1265_v9 }
  0xeb   : > { %671 = vst [vmem:[%s1269_s10 + $0x98] sm:$0xff] %v647_v40  ;;  %v636_v4 = vpack.c.bf16 %v589_v41, %v520_v38 }
  0xed   : > { %660 = vst [vmem:[%s1269_s10 + $0x40] sm:$0xff] %v636_v4  ;;  %v549_v43 = vpop.f32.mrf.mxu2 }
  0xee   : > { %v550_v44 = vadd.f32 %v549_v43, %v376_v42  ;;  %v618_v45 = vpop.f32.mrf.mxu3 }
  0xef   : > { %v619_v46 = vadd.f32 %v618_v45, %v376_v42  ;;  %v521_v47 = vpop.f32.mrf.mxu0 }
  0xf0   : > { %v522_v48 = vadd.f32 %v521_v47, %v1260_v5  ;;  %v590_v49 = vpop.f32.mrf.mxu1 }
  0xf1   : > { %v648_v50 = vpack.c.bf16 %v619_v46, %v550_v44  ;;  %v591_v51 = vadd.f32 %v590_v49, %v1260_v5 }
  0xf3   : > { %672 = vst [vmem:[%s1269_s10 + $0xa0] sm:$0xff] %v648_v50  ;;  %v637_v9 = vpack.c.bf16 %v591_v51, %v522_v48 }
  0xf5   : > { %661 = vst [vmem:[%s1269_s10 + $0x48] sm:$0xff] %v637_v9  ;;  %v551_v53 = vpop.f32.mrf.mxu2 }
  0xf6   : > { %v552_v54 = vadd.f32 %v551_v53, %v381_v52  ;;  %v620_v55 = vpop.f32.mrf.mxu3 }
  0xf7   : > { %v621_v56 = vadd.f32 %v620_v55, %v381_v52  ;;  %v524_v57 = vpop.f32.mrf.mxu0 }
  0xf8   : > { %v525_v58 = vadd.f32 %v524_v57, %v1267_v11  ;;  %v593_v59 = vpop.f32.mrf.mxu1 }
  0xf9   : > { %v649_v60 = vpack.c.bf16 %v621_v56, %v552_v54  ;;  %v594_v61 = vadd.f32 %v593_v59, %v1267_v11 }
  0xfb   : > { %673 = vst [vmem:[%s1269_s10 + $0xa8] sm:$0xff] %v649_v60  ;;  %v638_v5 = vpack.c.bf16 %v594_v61, %v525_v58 }
  0xfd   : > { %662 = vst [vmem:[%s1269_s10 + $0x50] sm:$0xff] %v638_v5  ;;  %v554_v63 = vpop.f32.mrf.mxu2 }
  0xfe   : > { %v555_v1 = vadd.f32 %v554_v63, %v386_v62  ;;  %v623_v6 = vpop.f32.mrf.mxu3 }
  0xff   : > { %v624_v7 = vadd.f32 %v623_v6, %v386_v62  ;;  %v526_v8 = vpop.f32.mrf.mxu0 }
 0x100   : > { %v527_v0 = vadd.f32 %v526_v8, %v1272_v23  ;;  %v595_v10 = vpop.f32.mrf.mxu1 }
 0x101   : > { %v650_v12 = vpack.c.bf16 %v624_v7, %v555_v1  ;;  %v596_v11 = vadd.f32 %v595_v10, %v1272_v23 }
 0x103   : > { %674 = vst [vmem:[%s1269_s10 + $0xb0] sm:$0xff] %v650_v12  ;;  %v639_v13 = vpack.c.bf16 %v596_v11, %v527_v0 }
 0x105   : > { %663 = vst [vmem:[%s1269_s10 + $0x58] sm:$0xff] %v639_v13  ;;  %v556_v15 = vpop.f32.mrf.mxu2 }
 0x106   : > { %v557_v16 = vadd.f32 %v556_v15, %v391_v14  ;;  %v625_v17 = vpop.f32.mrf.mxu3 }
 0x107   : > { %v626_v18 = vadd.f32 %v625_v17, %v391_v14 }
 0x109   : > { %v651_v19 = vpack.c.bf16 %v626_v18, %v557_v16 }
 0x10b   : > { %675 = vst [vmem:[%s1269_s10 + $0xb8] sm:$0xff] %v651_v19 }
 0x10c   : > { %966 = shalt.err (!%p963_p5)
}
 0x10d   : > { %s1020_s7 = smov 128   ;;  %s1021_s8 = smov 8  }
 0x10e   : > { %878 = dma.vmem_to_hbm [thread:$0]  (%p1082_p4), %s692_s15, 3072, %s694_s23, %s677_s26, %s1020_s7, %s1020_s7, %s1021_s8  }
 0x10f PF: > { %p884_p6 = scmp.ge.s32.totalorder %s1017_s17, 2  ;;  %s708_s9 = sand.u32 1, %s997_s12  }
 0x110   : > { %s709_s10 = scalar_lea.sflag [#allocation3], %s708_s9 }
 0x111   : > { %p881_p7 = pnand %p884_p6, %p1089_p8 }
 0x113   : > { %p882_p9 = pneg %p881_p7 }
 0x115   : > { %992 = dma.done.wait (%p882_p9), %s709_s10, 3072  }
 0x116   : > { %994 = vsyncadd (%p882_p9), %s709_s10, 4294964224  ;;  %s16_s17 = sadd.s32 1, %s1017_s17   ;;  %s1358_s12 = smov %s1001_s13 }
 0x117   : > { %p13_p10 = scmp.ge.s32.totalorder %s16_s17, 4   ;;  %s1359_s13 = smov %s1005_s14 }
 0x118   : > { %s1360_s14 = smov %s1095_s25  ;;  %s1361_s15 = smov %s1013_s16 }
 0x119   : > { %s1362_s16 = smov %s1364_s20  ;;  %15 = sbr.rel (!%p13_p10) target bundleno = 4 (0x4), region = 67 }
 0x11e   :  { %715 = vsyncpa [#allocation3], 1 }
 0x11f   :  { %717 = vsyncpa [#allocation3 + $0x1], 1 }

</bundles_post_ra>
